<compile_context>
chip_gen: v5e
topology: v5e:2x2
jax: 0.10.0
libtpu: 0.0.40
codegen_flags: <defaults>
</compile_context>

<pallas_src>
import functools

import jax
import jax.numpy as jnp
from jax.experimental import pallas as pl
from jax.experimental.pallas import tpu as pltpu

NEG_SLOPE = 0.2


def _discriminator_kernel(x_ref, w_ref, b_ref, o_ref):
    # x_ref: (TB, D) f32  w_ref: (D, H) bf16  b_ref: (1, H) f32  o_ref: (TB, H) bf16
    # Linear: cast x to bf16 in-kernel (hidden under DMA), bf16 x bf16 -> f32 on MXU.
    y = jnp.dot(x_ref[...].astype(jnp.bfloat16), w_ref[...],
                preferred_element_type=jnp.float32) + b_ref[...]

    # LeakyReLU(0.2): max(y, 0.2*y) is exact for slope < 1.  (2 VALU ops.)
    y = jnp.maximum(y, NEG_SLOPE * y)

    # Numerically stable softmax over the last (lane) dim, all in f32.
    # TODO(synk): on v6e/v7x a bf16 exp path exists; kept f32 for v5e portability.
    m = jnp.max(y, axis=-1, keepdims=True)
    e = jnp.exp(y - m)
    inv = pl.reciprocal(jnp.sum(e, axis=-1, keepdims=True), approx=True)  # EUP

    # Only the final store narrows to bf16.
    o_ref[...] = (e * inv).astype(o_ref.dtype)


def _cdiv(a, b):
    return -(-a // b)


def _pick_tiling(B, desired_tb):
    """Return (tile_rows, n_tiles, padded_B).

    - Tiny batches: one full-array block (block == array dims sidesteps the
      (8,128) constraint), no padding.
    - Otherwise: at least 2 tiles (so the 'parallel' axis splits across both
      v7x TensorCores), each at most `desired_tb` rows, sublane-aligned, with
      padding kept under 8 rows per tile.
    """
    if B <= 16:
        return B, 1, B
    n_tiles = max(2, _cdiv(B, desired_tb))
    tb = _cdiv(_cdiv(B, n_tiles), 8) * 8
    return tb, n_tiles, n_tiles * tb


@functools.partial(jax.jit, static_argnames=("tb",))
def discriminator_forward(x, w_t, b, *, tb=8192):
    """x: (B, D) f32, w_t: (D, H) f32 (transposed PyTorch weight), b: (1, H) f32.

    Returns softmax(leaky_relu(x @ w_t + b)) as (B, H) bf16.
    """
    B, D = x.shape
    D2, H = w_t.shape
    assert D == D2 and b.shape == (1, H)

    # VMEM budget: double-buffered f32 x-tile + bf16 out-tile under ~24 MB
    # (headroom inside v7x's 32 MiB default scoped / 64 MiB physical VMEM).
    bytes_per_row = D * 4 + H * 2
    tb_cap = max(8, (((24 << 20) // (2 * bytes_per_row)) // 8) * 8)
    tb_eff, n_tiles, Bp = _pick_tiling(B, min(tb, tb_cap))

    # Minimal ragged padding only (softmax reduces over H, so padded batch
    # rows are semantically inert and sliced off below).
    if Bp != B:
        x = jnp.pad(x, ((0, Bp - B), (0, 0)))

    # Tiny one-time cast of the resident weight; bias stays f32.
    w_bf = w_t.astype(jnp.bfloat16)
    b_f32 = b.astype(jnp.float32)

    bytes_accessed = (Bp * D * 4) + (D * H * 2) + (H * 4) + (Bp * H * 2)

    out = pl.pallas_call(
        _discriminator_kernel,
        out_shape=jax.ShapeDtypeStruct((Bp, H), jnp.bfloat16),
        grid_spec=pltpu.PrefetchScalarGridSpec(
            num_scalar_prefetch=0,
            grid=(n_tiles,),
            in_specs=[
                pl.BlockSpec((tb_eff, D), lambda i: (i, 0)),   # x tiles stream
                pl.BlockSpec((D, H), lambda i: (0, 0)),        # weight resident
                pl.BlockSpec((1, H), lambda i: (0, 0)),        # bias resident
            ],
            out_specs=pl.BlockSpec((tb_eff, H), lambda i: (i, 0)),
        ),
        compiler_params=pltpu.CompilerParams(
            dimension_semantics=("parallel",),                 # megacore-shardable
        ),
        cost_estimate=pl.CostEstimate(
            flops=2 * Bp * D * H,
            transcendentals=Bp * (H + 1),
            bytes_accessed=bytes_accessed,
        ),
    )(x, w_bf, b_f32)

    return out[:B]


def reference_forward(x, w_t, b):
    # Match the kernel's precision: bf16-rounded matmul operands, f32 accumulate.
    xb = x.astype(jnp.bfloat16).astype(jnp.float32)
    wb = w_t.astype(jnp.bfloat16).astype(jnp.float32)
    y = xb @ wb + b
    y = jnp.where(y >= 0.0, y, NEG_SLOPE * y)
    return jax.nn.softmax(y, axis=-1)


def _check(out, ref, n_rows, hidden):
    assert out.shape == (n_rows, hidden)
    assert out.dtype == jnp.bfloat16
    out_f32 = out.astype(jnp.float32)
    # Quantize the reference the same way the kernel's final store does, so
    # the comparison isolates accumulate-order + approx-reciprocal error.
    ref_bf = ref.astype(jnp.bfloat16).astype(jnp.float32)
    assert jnp.allclose(out_f32, ref_bf, atol=5e-3, rtol=5e-3), "mismatch vs reference"
    # Softmax rows sum to 1 only approximately (approx reciprocal + bf16 store).
    assert jnp.allclose(jnp.sum(out_f32, axis=-1), jnp.ones((n_rows,)), atol=1e-2)


if __name__ == "__main__":
    input_dim = 32
    hidden = 128

    key = jax.random.PRNGKey(0)
    k_x, k_w, k_b, k_x2, k_x3 = jax.random.split(key, 5)

    # PyTorch-like init: U(-1/sqrt(fan_in), 1/sqrt(fan_in)); weight is (out, in).
    bound = 1.0 / (input_dim ** 0.5)
    w_pt = jax.random.uniform(k_w, (hidden, input_dim), jnp.float32, -bound, bound)
    b_pt = jax.random.uniform(k_b, (hidden,), jnp.float32, -bound, bound)

    w_t = jnp.transpose(w_pt)            # (D, H)
    b = b_pt.reshape(1, hidden)          # (1, H)

    # --- small batch: single full-array block, no padding ---
    batch = 8
    x = jax.random.normal(k_x, (batch, input_dim), jnp.float32)
    out = jax.block_until_ready(discriminator_forward(x, w_t, b))
    _check(out, reference_forward(x, w_t, b), batch, hidden)

    # --- multi-tile batch: grid=(2,), no padding (pipelining + megacore split) ---
    batch2 = 256
    x2 = jax.random.normal(k_x2, (batch2, input_dim), jnp.float32)
    out2 = jax.block_until_ready(discriminator_forward(x2, w_t, b))
    _check(out2, reference_forward(x2, w_t, b), batch2, hidden)

    # --- ragged batch: 300 -> tiles of 152, pads only 4 rows (minimal-pad path) ---
    batch3 = 300
    x3 = jax.random.normal(k_x3, (batch3, input_dim), jnp.float32)
    out3 = jax.block_until_ready(discriminator_forward(x3, w_t, b))
    _check(out3, reference_forward(x3, w_t, b), batch3, hidden)

    print("KERNEL_OK")
</pallas_src>

<mosaic_0001>
module attributes {stable_mosaic.version = 11 : i64} {
  func.func @_discriminator_kernel(%arg0: i32, %arg1: memref<8x32xf32, #tpu.memory_space<vmem>>, %arg2: memref<32x128xbf16, #tpu.memory_space<vmem>>, %arg3: memref<1x128xf32, #tpu.memory_space<vmem>>, %arg4: memref<8x128xbf16, #tpu.memory_space<vmem>>) attributes {dimension_semantics = [#tpu.dimension_semantics<parallel>], iteration_bounds = array<i64: 1>, scalar_prefetch = 0 : i64, scratch_operands = 0 : i64, tpu.core_type = #tpu.core_type<tc>, window_params = [{transform_indices = @transform_0, window_bounds = array<i64: 8, 32>}, {pipeline_mode = #tpu.pipeline_mode<synchronous>, transform_indices = @transform_1, window_bounds = array<i64: 32, 128>}, {pipeline_mode = #tpu.pipeline_mode<synchronous>, transform_indices = @transform_2, window_bounds = array<i64: 1, 128>}, {transform_indices = @transform_3, window_bounds = array<i64: 8, 128>}]} {
    %c0 = arith.constant 0 : index
    %c0_0 = arith.constant 0 : index
    %0 = vector.load %arg1[%c0, %c0_0] : memref<8x32xf32, #tpu.memory_space<vmem>>, vector<8x32xf32>
    %1 = arith.truncf %0 : vector<8x32xf32> to vector<8x32xbf16>
    %c0_1 = arith.constant 0 : index
    %c0_2 = arith.constant 0 : index
    %2 = vector.load %arg2[%c0_1, %c0_2] : memref<32x128xbf16, #tpu.memory_space<vmem>>, vector<32x128xbf16>
    %cst = arith.constant dense<0.000000e+00> : vector<8x128xf32>
    %3 = tpu.matmul %1, %2, %cst {dimension_numbers = #tpu.dot_dimension_numbers<[1], [0], [0], [1], [0, 0, 1, 1], [], []>} : vector<8x32xbf16>, vector<32x128xbf16>, vector<8x128xf32> -> vector<8x128xf32>
    %c0_3 = arith.constant 0 : index
    %c0_4 = arith.constant 0 : index
    %4 = vector.load %arg3[%c0_3, %c0_4] : memref<1x128xf32, #tpu.memory_space<vmem>>, vector<1x128xf32>
    %5 = vector.broadcast %4 : vector<1x128xf32> to vector<8x128xf32>
    %6 = arith.addf %3, %5 : vector<8x128xf32>
    %cst_5 = arith.constant 2.000000e-01 : f32
    %7 = vector.broadcast %cst_5 : f32 to vector<8x128xf32>
    %8 = arith.mulf %7, %6 : vector<8x128xf32>
    %9 = arith.maximumf %6, %8 : vector<8x128xf32>
    %cst_6 = arith.constant dense<0xFF800000> : vector<8xf32>
    %10 = vector.multi_reduction <maximumf>, %9, %cst_6 [1] : vector<8x128xf32> to vector<8xf32>
    %11 = vector.shape_cast %10 : vector<8xf32> to vector<8x1xf32>
    %12 = vector.broadcast %11 : vector<8x1xf32> to vector<8x128xf32>
    %13 = arith.subf %9, %12 : vector<8x128xf32>
    %14 = math.exp %13 : vector<8x128xf32>
    %cst_7 = arith.constant dense<0.000000e+00> : vector<8xf32>
    %15 = vector.multi_reduction <add>, %14, %cst_7 [1] : vector<8x128xf32> to vector<8xf32>
    %16 = vector.shape_cast %15 : vector<8xf32> to vector<8x1xf32>
    %17 = tpu.reciprocal %16 {approx = true} : vector<8x1xf32> -> vector<8x1xf32>
    %18 = vector.broadcast %17 : vector<8x1xf32> to vector<8x128xf32>
    %19 = arith.mulf %14, %18 : vector<8x128xf32>
    %20 = arith.truncf %19 : vector<8x128xf32> to vector<8x128xbf16>
    %c0_8 = arith.constant 0 : index
    %c0_9 = arith.constant 0 : index
    %21 = vector.load %arg4[%c0_8, %c0_9] : memref<8x128xbf16, #tpu.memory_space<vmem>>, vector<8x128xbf16>
    tpu.vector_store %arg4[%c0_8, %c0_9], %20 {strides = array<i32>} : memref<8x128xbf16, #tpu.memory_space<vmem>>, vector<8x128xbf16>,
    return
  }
  func.func @transform_0(%arg0: i32) -> (i32, i32) {
    %c0_i32 = arith.constant 0 : i32
    %c0_i32_0 = arith.constant 0 : i32
    return %arg0, %c0_i32 : i32, i32
  }
  func.func @transform_1(%arg0: i32) -> (i32, i32) {
    %c0_i32 = arith.constant 0 : i32
    %c0_i32_0 = arith.constant 0 : i32
    %c0_i32_1 = arith.constant 0 : i32
    return %c0_i32, %c0_i32_0 : i32, i32
  }
  func.func @transform_2(%arg0: i32) -> (i32, i32) {
    %c0_i32 = arith.constant 0 : i32
    %c0_i32_0 = arith.constant 0 : i32
    %c0_i32_1 = arith.constant 0 : i32
    return %c0_i32, %c0_i32_0 : i32, i32
  }
  func.func @transform_3(%arg0: i32) -> (i32, i32) {
    %c0_i32 = arith.constant 0 : i32
    %c0_i32_0 = arith.constant 0 : i32
    return %arg0, %c0_i32 : i32, i32
  }
}

</mosaic_0001>

<bundles_post_ra>
// kernel: discriminator_forward.1
= control target key start
LH: loop header
LB: loop body
LE: loop exit
PB: predicated region body
PF: predicated region fallthrough
CT: control target
= control target key end

     0   :  { %s163_s0 = inlined_call_operand.vmem [shape: f32[8,32], index: 0, kind: input, shape index: {}]   ;;  %s164_s1 = inlined_call_operand.vmem [shape: bf16[32,128], index: 1, kind: input, shape index: {}]   ;;  %s165_s2 = inlined_call_operand.vmem [shape: f32[1,128], index: 2, kind: input, shape index: {}]   ;;  %s166_s3 = inlined_call_operand.hbm [shape: bf16[8,128], index: 3, kind: output, shape index: {}]  }
   0x1   :  { %v94_v0 = vld [vmem:[%s164_s1 + $0x8] sm:$0xff] }
   0x2   :  { %8 = vsyncpa [#allocation3], 0  ;;  %48 = vmatpush.bf16.msra.mxu0 %v94_v0  ;;  %v93_v1 = vld [vmem:[%s164_s1] sm:$0xff]  ;;  %vm38_vm0 = vcmask 261120  }
   0x3   :  { %v16_v2 = vld [vmem:[%s163_s0] sm:$0xff]  ;;  %s127_s0 = smov [#allocation2]  }
   0x4   :  { %v17_v3 = vpack.c.bf16 %v16_v2, %v16_v2  ;;  %v96_v4 = vld [vmem:[%s165_s2] ss:$0 sm:$0xff]  ;;  %s73_s1 = sshll.u32 %s127_s0, 4  ;;  %s75_s2 = sshll.u32 %s166_s3, 4  ;;  %s74_s1 = int_to_ptr.vmem [resolvable:$true] %s73_s1  ;;  %s76_s2 = int_to_ptr.hbm [resolvable:$true] %s75_s2 }
   0x6   :  { %49 = vmatpush.bf16.msra.mxu0 %v93_v1 }
   0x9   :  { %92 = vmatmul.msk.bf16.vlgmr.msra.gmra.mxu0 %vm38_vm0, %v17_v3 }
  0x86   :  { %v51_v5 = vpop.f32.mrf.mxu0 }
  0x87   :  { %v52_v6 = vadd.f32 %v96_v4, %v51_v5 }
  0x89   :  { %v55_v7 = vmul.f32 0.2, %v52_v6 }
  0x8b   :  { %v56_v8 = vmax.f32 %v52_v6, %v55_v7 }
  0x8d   :  { %57 = vmax.xlane.f32.xlu0 %v56_v8 }
  0x8e   :  { %v53_v9 = vpop.f32.mrf.mxu0 }
 0x100   :  { %v58_v10 = vpop.xlane.xlu0 %57 }
 0x101   :  { %v59_v11 = vsub.f32 %v56_v8, %v58_v10 }
 0x103   :  { %v60_v12 = vmul.f32 1.442695, %v59_v11 }
 0x105   :  { %97 = vpow2.f32 %v60_v12 }
 0x10b   :  { %v98_v13 = vpop.eup %97 }
 0x10c   :  { %62 = vadd.xlane.f32.xlu0 %v98_v13 }
 0x17f   :  { %v63_v14 = vpop.xlane.xlu0 %62 }
 0x180   :  { %99 = vrcp.f32 %v63_v14 }
 0x186   :  { %v100_v15 = vpop.eup %99 }
 0x187   :  { %v65_v16 = vmul.f32 %v100_v15, %v98_v13 }
 0x189   :  { %v66_v17 = vpack.c.bf16 %v65_v16, %v65_v16 }
 0x18b   :  { %67 = vst [vmem:[#allocation2] sm:$0xf] %v66_v17 }
 0x18c   :  { %78 = dma.vmem_to_hbm [thread:$0]  %s74_s1, 64, %s76_s2, [#allocation3]  }
 0x18d   :  { %125 = dma.done.wait [#allocation3], 64  }
 0x18e   :  { %126 = vsyncadd [#allocation3], 4294967232 }
 0x18f   :  { %83 = vsyncpa [#allocation3], 1 }

</bundles_post_ra>
